<compile_context>
chip_gen: v7x
topology: tpu7x:2x2x1
jax: 0.10.0
libtpu: 0.0.40
codegen_flags: <defaults>
</compile_context>

<pallas_src>
import jax
import jax.numpy as jnp
from jax.experimental import pallas as pl
from jax.experimental.pallas import tpu as pltpu

MAX_BLOCK_B = 1024   # rows per grid step (multiple of 8; 512-1024 is the sweet spot)


def mlp_kernel(x_ref, w1_ref, b1_ref, w2_ref, b2_ref, o_ref, h_ref):
    # Layer 1: MXU matmul with f32 accumulation; bias + ReLU on the VPU.
    # Result is staged in a VMEM scratch (h_ref) so the (BLOCK_B, hidden)
    # intermediate streams through instead of living in vregs.
    h = jnp.dot(x_ref[...], w1_ref[...], preferred_element_type=jnp.float32)
    h_ref[...] = jnp.maximum(h + b1_ref[...], 0.0).astype(h_ref.dtype)

    # Layer 2: logits at their true width (n_actions).  The output block spans
    # the full last dim, so the writeback DMA is one contiguous chunk.
    o = jnp.dot(h_ref[...], w2_ref[...], preferred_element_type=jnp.float32)
    o_ref[...] = (o + b2_ref[...]).astype(o_ref.dtype)


def prepare_params(w1, b1, w2, b2, compute_dtype=jnp.float32):
    """One-time layout prep (do this at init, NOT per forward call).

    PyTorch layout in:  w1 [hidden, obs], b1 [hidden], w2 [n_actions, hidden],
                        b2 [n_actions].
    Kernel layout out:  w1_t [obs, hidden], b1 [1, hidden],
                        w2_t [hidden, n_actions], b2 [1, n_actions].
    Weights are cast to `compute_dtype` (use bf16 on v6e/v7x to halve DMA
    bytes); biases stay f32 (added post-accumulation).
    """
    w1_t = jnp.asarray(w1, compute_dtype).T
    b1_r = jnp.asarray(b1, jnp.float32).reshape(1, -1)
    w2_t = jnp.asarray(w2, compute_dtype).T
    b2_r = jnp.asarray(b2, jnp.float32).reshape(1, -1)
    return w1_t, b1_r, w2_t, b2_r


@jax.jit
def net_forward(x, w1_t, b1_r, w2_t, b2_r):
    """Forward pass: y = relu(x @ W1 + b1) @ W2 + b2.

    Args:
      x: [B, obs_size] float array.
      w1_t, b1_r, w2_t, b2_r: prepared params from `prepare_params`.
    Returns:
      [B, n_actions] float32 logits.
    """
    B, obs = x.shape
    hidden = w1_t.shape[1]
    n_actions = w2_t.shape[1]
    compute_dtype = w1_t.dtype
    x = x.astype(compute_dtype)   # no-op for the default f32 path

    # Adaptive block: one grid step for the small rollout batches, 1024-row
    # tiles (plus a ragged last block) for large CEM batches.  No padding.
    block_b = B if B <= MAX_BLOCK_B else MAX_BLOCK_B
    num_blocks = pl.cdiv(B, block_b)

    flops = 2 * B * (obs * hidden + hidden * n_actions)
    bytes_accessed = (
        x.size * x.dtype.itemsize
        + w1_t.size * w1_t.dtype.itemsize + b1_r.size * 4
        + w2_t.size * w2_t.dtype.itemsize + b2_r.size * 4
        + B * n_actions * 4
    )

    out = pl.pallas_call(
        mlp_kernel,
        out_shape=jax.ShapeDtypeStruct((B, n_actions), jnp.float32),
        grid=(num_blocks,),
        in_specs=[
            pl.BlockSpec((block_b, obs), lambda i: (i, 0)),        # x tile (contiguous DMA)
            pl.BlockSpec((obs, hidden), lambda i: (0, 0)),         # W1 (resident)
            pl.BlockSpec((1, hidden), lambda i: (0, 0)),           # b1 (resident)
            pl.BlockSpec((hidden, n_actions), lambda i: (0, 0)),   # W2 (resident)
            pl.BlockSpec((1, n_actions), lambda i: (0, 0)),        # b2 (resident)
        ],
        out_specs=pl.BlockSpec((block_b, n_actions), lambda i: (i, 0)),
        scratch_shapes=[pltpu.VMEM((block_b, hidden), compute_dtype)],
        compiler_params=pltpu.CompilerParams(
            dimension_semantics=("parallel",),
        ),
        cost_estimate=pl.CostEstimate(
            flops=flops, transcendentals=0, bytes_accessed=bytes_accessed
        ),
    )(x, w1_t, b1_r, w2_t, b2_r)

    return out


def init_params(key, obs_size, hidden_size, n_actions):
    """PyTorch nn.Linear default init: U[-1/sqrt(fan_in), 1/sqrt(fan_in)]."""
    k1, k2, k3, k4 = jax.random.split(key, 4)
    bound1 = 1.0 / jnp.sqrt(obs_size)
    bound2 = 1.0 / jnp.sqrt(hidden_size)
    w1 = jax.random.uniform(k1, (hidden_size, obs_size), jnp.float32, -bound1, bound1)
    b1 = jax.random.uniform(k2, (hidden_size,), jnp.float32, -bound1, bound1)
    w2 = jax.random.uniform(k3, (n_actions, hidden_size), jnp.float32, -bound2, bound2)
    b2 = jax.random.uniform(k4, (n_actions,), jnp.float32, -bound2, bound2)
    return w1, b1, w2, b2


if __name__ == "__main__":
    # CartPole-like sizes: obs=4, hidden=32, actions=2, small batch=16.
    obs_size, hidden_size, n_actions, batch = 4, 32, 2, 16

    key = jax.random.PRNGKey(0)
    kx, kp = jax.random.split(key)
    x = jax.random.normal(kx, (batch, obs_size), jnp.float32)
    w1, b1, w2, b2 = init_params(kp, obs_size, hidden_size, n_actions)

    def ref_fn(xx):
        return jnp.maximum(xx @ w1.T + b1, 0.0) @ w2.T + b2

    # f32 path, small batch (single grid step, no padding anywhere).
    params_f32 = prepare_params(w1, b1, w2, b2)
    out = jax.block_until_ready(net_forward(x, *params_f32))
    assert out.shape == (batch, n_actions)
    assert jnp.allclose(out, ref_fn(x), atol=1e-5, rtol=1e-5)

    # Larger ragged batch: multiple 1024-row grid steps + partial last block.
    xb = jax.random.normal(kx, (2500, obs_size), jnp.float32)
    outb = jax.block_until_ready(net_forward(xb, *params_f32))
    assert outb.shape == (2500, n_actions)
    assert jnp.allclose(outb, ref_fn(xb), atol=1e-5, rtol=1e-5)

    # bf16 weight/activation variant (v6e/v7x DMA-bytes saver), f32 accumulation.
    params_bf16 = prepare_params(w1, b1, w2, b2, compute_dtype=jnp.bfloat16)
    outh = jax.block_until_ready(net_forward(x, *params_bf16))
    assert outh.shape == (batch, n_actions)
    assert jnp.allclose(outh, ref_fn(x), atol=5e-2, rtol=5e-2)

    print("KERNEL_OK")
</pallas_src>

<mosaic_0001>
module attributes {stable_mosaic.version = 11 : i64} {
  func.func @mlp_kernel(%arg0: i32, %arg1: memref<16x4xf32, #tpu.memory_space<vmem>>, %arg2: memref<4x32xf32, #tpu.memory_space<vmem>>, %arg3: memref<1x32xf32, #tpu.memory_space<vmem>>, %arg4: memref<32x2xf32, #tpu.memory_space<vmem>>, %arg5: memref<1x2xf32, #tpu.memory_space<vmem>>, %arg6: memref<16x2xf32, #tpu.memory_space<vmem>>, %arg7: memref<16x32xf32, #tpu.memory_space<vmem>>) attributes {dimension_semantics = [#tpu.dimension_semantics<parallel>], iteration_bounds = array<i64: 1>, scalar_prefetch = 0 : i64, scratch_operands = 1 : i64, tpu.core_type = #tpu.core_type<tc>, window_params = [{transform_indices = @transform_0, window_bounds = array<i64: 16, 4>}, {pipeline_mode = #tpu.pipeline_mode<synchronous>, transform_indices = @transform_1, window_bounds = array<i64: 4, 32>}, {pipeline_mode = #tpu.pipeline_mode<synchronous>, transform_indices = @transform_2, window_bounds = array<i64: 1, 32>}, {pipeline_mode = #tpu.pipeline_mode<synchronous>, transform_indices = @transform_3, window_bounds = array<i64: 32, 2>}, {pipeline_mode = #tpu.pipeline_mode<synchronous>, transform_indices = @transform_4, window_bounds = array<i64: 1, 2>}, {transform_indices = @transform_5, window_bounds = array<i64: 16, 2>}]} {
    %c0 = arith.constant 0 : index
    %c0_0 = arith.constant 0 : index
    %0 = vector.load %arg1[%c0, %c0_0] : memref<16x4xf32, #tpu.memory_space<vmem>>, vector<16x4xf32>
    %c0_1 = arith.constant 0 : index
    %c0_2 = arith.constant 0 : index
    %1 = vector.load %arg2[%c0_1, %c0_2] : memref<4x32xf32, #tpu.memory_space<vmem>>, vector<4x32xf32>
    %cst = arith.constant dense<0.000000e+00> : vector<16x32xf32>
    %2 = tpu.matmul %0, %1, %cst {dimension_numbers = #tpu.dot_dimension_numbers<[1], [0], [0], [1], [0, 0, 1, 1], [], []>} : vector<16x4xf32>, vector<4x32xf32>, vector<16x32xf32> -> vector<16x32xf32>
    %c0_3 = arith.constant 0 : index
    %c0_4 = arith.constant 0 : index
    %3 = vector.load %arg3[%c0_3, %c0_4] : memref<1x32xf32, #tpu.memory_space<vmem>>, vector<1x32xf32>
    %4 = vector.broadcast %3 : vector<1x32xf32> to vector<16x32xf32>
    %5 = arith.addf %2, %4 : vector<16x32xf32>
    %cst_5 = arith.constant 0.000000e+00 : f32
    %6 = vector.broadcast %cst_5 : f32 to vector<16x32xf32>
    %7 = arith.maximumf %5, %6 : vector<16x32xf32>
    %c0_6 = arith.constant 0 : index
    %c0_7 = arith.constant 0 : index
    %8 = vector.load %arg7[%c0_6, %c0_7] : memref<16x32xf32, #tpu.memory_space<vmem>>, vector<16x32xf32>
    tpu.vector_store %arg7[%c0_6, %c0_7], %7 {strides = array<i32>} : memref<16x32xf32, #tpu.memory_space<vmem>>, vector<16x32xf32>,
    %c0_8 = arith.constant 0 : index
    %c0_9 = arith.constant 0 : index
    %9 = vector.load %arg7[%c0_8, %c0_9] : memref<16x32xf32, #tpu.memory_space<vmem>>, vector<16x32xf32>
    %c0_10 = arith.constant 0 : index
    %c0_11 = arith.constant 0 : index
    %10 = vector.load %arg4[%c0_10, %c0_11] : memref<32x2xf32, #tpu.memory_space<vmem>>, vector<32x2xf32>
    %cst_12 = arith.constant dense<0.000000e+00> : vector<16x2xf32>
    %11 = tpu.matmul %9, %10, %cst_12 {dimension_numbers = #tpu.dot_dimension_numbers<[1], [0], [0], [1], [0, 0, 1, 1], [], []>} : vector<16x32xf32>, vector<32x2xf32>, vector<16x2xf32> -> vector<16x2xf32>
    %c0_13 = arith.constant 0 : index
    %c0_14 = arith.constant 0 : index
    %12 = vector.load %arg5[%c0_13, %c0_14] : memref<1x2xf32, #tpu.memory_space<vmem>>, vector<1x2xf32>
    %13 = vector.broadcast %12 : vector<1x2xf32> to vector<16x2xf32>
    %14 = arith.addf %11, %13 : vector<16x2xf32>
    %c0_15 = arith.constant 0 : index
    %c0_16 = arith.constant 0 : index
    %15 = vector.load %arg6[%c0_15, %c0_16] : memref<16x2xf32, #tpu.memory_space<vmem>>, vector<16x2xf32>
    tpu.vector_store %arg6[%c0_15, %c0_16], %14 {strides = array<i32>} : memref<16x2xf32, #tpu.memory_space<vmem>>, vector<16x2xf32>,
    return
  }
  func.func @transform_0(%arg0: i32) -> (i32, i32) {
    %c0_i32 = arith.constant 0 : i32
    %c0_i32_0 = arith.constant 0 : i32
    return %arg0, %c0_i32 : i32, i32
  }
  func.func @transform_1(%arg0: i32) -> (i32, i32) {
    %c0_i32 = arith.constant 0 : i32
    %c0_i32_0 = arith.constant 0 : i32
    %c0_i32_1 = arith.constant 0 : i32
    return %c0_i32, %c0_i32_0 : i32, i32
  }
  func.func @transform_2(%arg0: i32) -> (i32, i32) {
    %c0_i32 = arith.constant 0 : i32
    %c0_i32_0 = arith.constant 0 : i32
    %c0_i32_1 = arith.constant 0 : i32
    return %c0_i32, %c0_i32_0 : i32, i32
  }
  func.func @transform_3(%arg0: i32) -> (i32, i32) {
    %c0_i32 = arith.constant 0 : i32
    %c0_i32_0 = arith.constant 0 : i32
    %c0_i32_1 = arith.constant 0 : i32
    return %c0_i32, %c0_i32_0 : i32, i32
  }
  func.func @transform_4(%arg0: i32) -> (i32, i32) {
    %c0_i32 = arith.constant 0 : i32
    %c0_i32_0 = arith.constant 0 : i32
    %c0_i32_1 = arith.constant 0 : i32
    return %c0_i32, %c0_i32_0 : i32, i32
  }
  func.func @transform_5(%arg0: i32) -> (i32, i32) {
    %c0_i32 = arith.constant 0 : i32
    %c0_i32_0 = arith.constant 0 : i32
    return %arg0, %c0_i32 : i32, i32
  }
}

</mosaic_0001>

<bundles_post_ra>
// kernel: net_forward.1
= control target key start
LH: loop header
LB: loop body
LE: loop exit
PB: predicated region body
PF: predicated region fallthrough
CT: control target
= control target key end

     0   :  { %vm37_vm0 = vcmask 1043456   ;;  %vm30_vm1 = vcmask 31744   ;;  %vm118_vm2 = vcmask 261120   ;;  %vm215_vm3 = vcmask 15360   ;;  %s325_s1 = inlined_call_operand.vmem [shape: f32[4,32], index: 1, kind: input, shape index: {}]   ;;  %s326_s0 = inlined_call_operand.vmem [shape: f32[16,4], index: 0, kind: input, shape index: {}]   ;;  %s327_s3 = inlined_call_operand.vmem [shape: f32[32,2], index: 3, kind: input, shape index: {}]   ;;  %s328_s2 = inlined_call_operand.vmem [shape: f32[1,32], index: 2, kind: input, shape index: {}]   ;;  %s329_s4 = inlined_call_operand.vmem [shape: f32[1,2], index: 4, kind: input, shape index: {}]   ;;  %s330_s5 = inlined_call_operand.vmem [shape: f32[16,2], index: 5, kind: output, shape index: {}]  }
   0x1   :  { %v22_v0 = vld [vmem:[%s325_s1] sm:$0xf]  ;;  %v21_v2 = vld [vmem:[%s326_s0 + $0x8] sm:$0xff]  ;;  %v125_v6 = vld [vmem:[%s327_s3 + $0x10] sm:$0xff] }
   0x2   :  { %v20_v1 = vld [vmem:[%s326_s0] sm:$0xff]  ;;  %238 = vmatprep.subr.msk.mxu0 %vm37_vm0, %v22_v0  ;;  %v124_v4 = vld [vmem:[%s327_s3 + $0x8] sm:$0xff]  ;;  %v126_v7 = vld [vmem:[%s327_s3 + $0x18] sm:$0xff] }
   0x3   :  { %240 = vmatprep.mubr.msk.f32.mxu0 %vm30_vm1, %v20_v1  ;;  %239 = vmatpush3.msk.msra.mxu0 %vm37_vm0, %v22_v0  ;;  %v123_v3 = vld [vmem:[%s327_s3] sm:$0xff]  ;;  %v258_v8 = vpack.c.bf16 %v126_v7, %v125_v6 }
   0x4   :  { %241 = vmatmul.mubr.msk.f32.vlgmr.msra.gmra.mrb[0].mxu0 %vm30_vm1, %v21_v2  ;;  %v254_v5 = vpack.c.bf16 %v124_v4, %v123_v3  ;;  %v222_v9 = vld [vmem:[%s328_s2] ss:$0 sm:$0xff] }
   0x5   :  { %v226_v18 = vld [vmem:[%s329_s4] ss:$0 sm:$0xff] }
   0x6   :  { %255 = vmatprep.subr.bf16.mxu1 %v254_v5 }
   0x7   :  { %257 = vmatpush3.bf16.msra.mxu1 %v254_v5 }
   0x8   :  { %259 = vmatprep.subr.bf16.mxu1 %v258_v8 }
   0xb   :  { %261 = vmatpush3.bf16.msra.mxu1 %v258_v8 }
  0xd7   :  { %v242_v10 = vpop.f32.mrb[0].mxu0 }
  0xd8   :  { %v113_v11 = vadd.f32 %v242_v10, %v222_v9  ;;  %v107_v12 = vpop.f32.mrb[1].mxu0 }
  0xd9   :  { %v108_v13 = vadd.f32 %v222_v9, %v107_v12 }
  0xda   :  { %v117_v14 = vmax.f32 %v113_v11, 0.0 }
  0xdb   :  { %v116_v15 = vmax.f32 %v108_v13, 0.0 }
  0xdc   :  { %120 = vst.msk [vmem:[#allocation2 + $0x8] sm:$0xff] %vm118_vm2, %v117_v14 }
  0xdd   :  { %119 = vst.msk [vmem:[#allocation2] sm:$0xff] %vm118_vm2, %v116_v15 }
  0xe3   :  { %v122_v17 = vld [vmem:[#allocation2 + $0x8] sm:$0xff] }
  0xe4   :  { %v121_v16 = vld [vmem:[#allocation2] sm:$0xff] }
  0xe5   :  { %251 = vmatprep.mubr.msk.f32.mxu1 %vm118_vm2, %v121_v16 }
  0xe6   :  { %252 = vmatmul.mubr.msk.f32.vlgmr.msra.gmra.mrb[0].mxu1 %vm118_vm2, %v122_v17 }
 0x1b9   :  { %v253_v19 = vpop.f32.mrb[0].mxu1 }
 0x1ba   :  { %v212_v20 = vadd.f32 %v253_v19, %v226_v18  ;;  %v206_v21 = vpop.f32.mrb[1].mxu1 }
 0x1bb   :  { %v207_v22 = vadd.f32 %v226_v18, %v206_v21 }
 0x1bc   :  { %217 = vst.msk [vmem:[%s330_s5 + $0x8] sm:$0xff] %vm215_vm3, %v212_v20 }
 0x1bd   :  { %216 = vst.msk [vmem:[%s330_s5] sm:$0xff] %vm215_vm3, %v207_v22 }

</bundles_post_ra>
